<compile_context>
chip_gen: v6e
topology: v6e:2x2x1
jax: 0.10.0
libtpu: 0.0.40
codegen_flags: <defaults>
</compile_context>

<pallas_src>
import jax
import jax.numpy as jnp
from jax.experimental import pallas as pl
from jax.experimental.pallas import tpu as pltpu


def _proj_head_kernel(x_ref, w1_ref, b1_ref, w2_ref, b2_ref, o_ref):
    # x_ref: (1, C, tm) voxel tile — channels on sublanes, voxels on lanes.
    x = x_ref[0]                                                      # (C, tm)

    # Conv3d(C, C, 1) with eval-mode BN folded in, then ReLU:  h = W1f @ x + b1f
    h = jnp.dot(w1_ref[...], x, preferred_element_type=jnp.float32) + b1_ref[...]
    h = jnp.maximum(h, 0.0)

    # Conv3d(C, P, 1):  y = W2 @ h + b2                         -> (P, tm)
    y = jnp.dot(w2_ref[...], h, preferred_element_type=jnp.float32) + b2_ref[...]

    # F.normalize(p=2, dim=channel): channel is the sublane axis here.
    nrm2 = jnp.sum(y * y, axis=0, keepdims=True)                      # (1, tm)
    inv = jax.lax.rsqrt(jnp.maximum(nrm2, 1e-24))                     # == 1/max(||y||, 1e-12)
    o_ref[0] = (y * inv).astype(o_ref.dtype)


def _round_up(a, b):
    return ((a + b - 1) // b) * b


def _choose_voxel_tile(S, N, C, P, in_bytes, out_bytes, tm_cap, vmem_budget):
    """Pick a lane-dense (multiple-of-128) voxel tile.

    Prefers a divisor of S (no input pad, no output post-slice); caps the tile
    so the double-buffered working set stays inside `vmem_budget`; keeps at
    least two total grid steps when possible so v7x can use both TensorCores.
    Returns (tile, needs_padding).
    """
    def ws(t):  # 2x-buffered in/out DMA tiles + f32 temps (h, y)
        return 2 * t * (C * in_bytes + P * out_bytes) + t * (C + P) * 4

    cap = max(128, (tm_cap // 128) * 128)
    while cap > 128 and ws(cap) > vmem_budget:
        cap -= 128

    if S % 128 == 0:
        m = S // 128
        # Keep >= 2 parallel grid steps in total when the batch can't provide them.
        max_d = m if (N >= 2 or m == 1) else max(1, m // 2)
        max_d = min(max_d, cap // 128)
        best = 1
        for d in range(1, max_d + 1):
            if m % d == 0:
                best = d
        tile = 128 * best
        # Accept unless the divisor structure forces a pathologically small tile.
        if tile >= min(cap, 2048) or S // tile <= 16:
            return tile, False

    # Fallback: pad S up to a multiple of the tile (ragged / awkward S only).
    tile = min(cap, _round_up(S, 128))
    if N == 1 and tile >= 256 and tile == _round_up(S, 128):
        # Split so both v7x TensorCores get work even with a single batch.
        tile = _round_up((tile + 1) // 2, 128)
    return tile, True


def projection_head_pallas(x, params, *, tm=16384, out_dtype=None,
                           vmem_budget_bytes=24 * 1024 * 1024):
    """x: [N, C, D, H, W] (NCDHW, like PyTorch). Returns [N, P, D, H, W]."""
    w1, b1, gamma, beta, run_mean, run_var, w2, b2 = params
    N, C, D, H, W = x.shape
    P = w2.shape[0]
    eps = 1e-5
    out_dtype = x.dtype if out_dtype is None else out_dtype

    # Fold eval-mode BN into conv1 (tiny wrapper glue, not the hot path).
    inv_std = 1.0 / jnp.sqrt(run_var.astype(jnp.float32) + eps)
    scale = gamma.astype(jnp.float32) * inv_std                          # (C,)
    w1f = scale[:, None] * w1.astype(jnp.float32)                        # (C, C)
    b1f = (scale * b1.astype(jnp.float32)
           + beta.astype(jnp.float32)
           - run_mean.astype(jnp.float32) * scale).reshape(C, 1)         # (C, 1)
    w2f = w2.astype(jnp.float32)                                         # (P, C)
    b2f = b2.astype(jnp.float32).reshape(P, 1)                           # (P, 1)
    if x.dtype == jnp.bfloat16:
        # Keep MXU inputs bf16 so the kernel never upcasts the (C, tm) tile.
        w1f = w1f.astype(jnp.bfloat16)
        w2f = w2f.astype(jnp.bfloat16)

    # Native channel-major layout: just flatten spatial dims (no transpose).
    S = D * H * W
    xs = x.reshape(N, C, S)

    in_bytes = jnp.dtype(x.dtype).itemsize
    out_bytes = jnp.dtype(out_dtype).itemsize
    tm_eff, needs_pad = _choose_voxel_tile(S, N, C, P, in_bytes, out_bytes,
                                           tm, vmem_budget_bytes)
    if needs_pad:
        # TODO(synk): ragged (non-128-multiple) S falls back to pad + slice; an
        # in-kernel masked tail store would remove this extra HBM traffic.
        S_pad = _round_up(S, tm_eff)
        xs = jnp.pad(xs, ((0, 0), (0, 0), (0, S_pad - S)))
    else:
        S_pad = S

    grid = (N, S_pad // tm_eff)
    full = lambda n, j: (0, 0)   # constant-index weight blocks: fetched once

    # VMEM limit from the actual working set (2x headroom for pipelining),
    # floored at the 32 MiB scoped default and kept v7x-safe (<= 48 MiB).
    ws = (2 * tm_eff * (C * in_bytes + P * out_bytes)
          + tm_eff * (C + P) * 4
          + (C * C + P * C + C + P) * 4)
    vmem_limit = int(min(max(2 * ws, 32 * 1024 * 1024), 48 * 1024 * 1024))

    out = pl.pallas_call(
        _proj_head_kernel,
        out_shape=jax.ShapeDtypeStruct((N, P, S_pad), out_dtype),
        grid_spec=pltpu.PrefetchScalarGridSpec(
            num_scalar_prefetch=0,
            grid=grid,
            in_specs=[
                pl.BlockSpec((1, C, tm_eff), lambda n, j: (n, 0, j)),  # x tile
                pl.BlockSpec((C, C), full),                            # W1 (BN folded)
                pl.BlockSpec((C, 1), full),                            # b1 (BN folded)
                pl.BlockSpec((P, C), full),                            # W2
                pl.BlockSpec((P, 1), full),                            # b2
            ],
            out_specs=pl.BlockSpec((1, P, tm_eff), lambda n, j: (n, 0, j)),
        ),
        compiler_params=pltpu.CompilerParams(
            dimension_semantics=("parallel", "parallel"),
            vmem_limit_bytes=vmem_limit,
        ),
    )(xs, w1f, b1f, w2f, b2f)

    if S_pad != S:
        out = out[:, :, :S]
    return out.reshape(N, P, D, H, W)


def _reference(x, params):
    """Plain-JAX reference matching the PyTorch forward (eval-mode BN)."""
    w1, b1, gamma, beta, run_mean, run_var, w2, b2 = params
    eps = 1e-5
    y = jnp.einsum('ncdhw,oc->nodhw', x, w1) + b1[None, :, None, None, None]
    y = (y - run_mean[None, :, None, None, None]) / jnp.sqrt(
        run_var[None, :, None, None, None] + eps)
    y = y * gamma[None, :, None, None, None] + beta[None, :, None, None, None]
    y = jnp.maximum(y, 0.0)
    y = jnp.einsum('ncdhw,oc->nodhw', y, w2) + b2[None, :, None, None, None]
    nrm = jnp.maximum(jnp.sqrt(jnp.sum(y * y, axis=1, keepdims=True)), 1e-12)
    return y / nrm


def _init_params(key, dim_in, proj_dim):
    ks = jax.random.split(key, 8)
    w1 = 0.2 * jax.random.normal(ks[0], (dim_in, dim_in), jnp.float32)
    b1 = 0.1 * jax.random.normal(ks[1], (dim_in,), jnp.float32)
    gamma = 1.0 + 0.1 * jax.random.normal(ks[2], (dim_in,), jnp.float32)
    beta = 0.1 * jax.random.normal(ks[3], (dim_in,), jnp.float32)
    run_mean = 0.1 * jax.random.normal(ks[4], (dim_in,), jnp.float32)
    run_var = jnp.abs(1.0 + 0.1 * jax.random.normal(ks[5], (dim_in,), jnp.float32))
    w2 = 0.2 * jax.random.normal(ks[6], (proj_dim, dim_in), jnp.float32)
    b2 = 0.1 * jax.random.normal(ks[7], (proj_dim,), jnp.float32)
    return (w1, b1, gamma, beta, run_mean, run_var, w2, b2)


if __name__ == "__main__":
    key = jax.random.PRNGKey(0)
    kx, kp = jax.random.split(key)

    N, C, D, H, W = 2, 8, 8, 8, 8       # dim_in = 8
    proj_dim = 32

    x = jax.random.normal(kx, (N, C, D, H, W), jnp.float32)
    params = _init_params(kp, C, proj_dim)

    out = projection_head_pallas(x, params)
    out = jax.block_until_ready(out)

    ref = _reference(x, params)
    assert out.shape == (N, proj_dim, D, H, W)
    assert jnp.allclose(out, ref, atol=1e-5, rtol=1e-5), (
        float(jnp.max(jnp.abs(out - ref))))

    print("KERNEL_OK")
</pallas_src>

<mosaic_0001>
module attributes {stable_mosaic.version = 11 : i64} {
  func.func @_proj_head_kernel(%arg0: i32, %arg1: i32, %arg2: memref<1x8x512xf32, #tpu.memory_space<vmem>>, %arg3: memref<8x8xf32, #tpu.memory_space<vmem>>, %arg4: memref<8x1xf32, #tpu.memory_space<vmem>>, %arg5: memref<32x8xf32, #tpu.memory_space<vmem>>, %arg6: memref<32x1xf32, #tpu.memory_space<vmem>>, %arg7: memref<1x32x512xf32, #tpu.memory_space<vmem>>) attributes {dimension_semantics = [#tpu.dimension_semantics<parallel>, #tpu.dimension_semantics<parallel>], iteration_bounds = array<i64: 2, 1>, scalar_prefetch = 0 : i64, scratch_operands = 0 : i64, tpu.core_type = #tpu.core_type<tc>, window_params = [{transform_indices = @transform_0, window_bounds = array<i64: 1, 8, 512>}, {pipeline_mode = #tpu.pipeline_mode<synchronous>, transform_indices = @transform_1, window_bounds = array<i64: 8, 8>}, {pipeline_mode = #tpu.pipeline_mode<synchronous>, transform_indices = @transform_2, window_bounds = array<i64: 8, 1>}, {pipeline_mode = #tpu.pipeline_mode<synchronous>, transform_indices = @transform_3, window_bounds = array<i64: 32, 8>}, {pipeline_mode = #tpu.pipeline_mode<synchronous>, transform_indices = @transform_4, window_bounds = array<i64: 32, 1>}, {transform_indices = @transform_5, window_bounds = array<i64: 1, 32, 512>}]} {
    %c0 = arith.constant 0 : index
    %c0_0 = arith.constant 0 : index
    %c0_1 = arith.constant 0 : index
    %0 = vector.load %arg2[%c0, %c0_0, %c0_1] : memref<1x8x512xf32, #tpu.memory_space<vmem>>, vector<1x8x512xf32>
    %1 = vector.shape_cast %0 : vector<1x8x512xf32> to vector<8x512xf32>
    %c0_2 = arith.constant 0 : index
    %c0_3 = arith.constant 0 : index
    %2 = vector.load %arg3[%c0_2, %c0_3] : memref<8x8xf32, #tpu.memory_space<vmem>>, vector<8x8xf32>
    %cst = arith.constant dense<0.000000e+00> : vector<8x512xf32>
    %3 = tpu.matmul %2, %1, %cst {dimension_numbers = #tpu.dot_dimension_numbers<[1], [0], [0], [1], [0, 0, 1, 1], [], []>} : vector<8x8xf32>, vector<8x512xf32>, vector<8x512xf32> -> vector<8x512xf32>
    %c0_4 = arith.constant 0 : index
    %c0_5 = arith.constant 0 : index
    %4 = vector.load %arg4[%c0_4, %c0_5] : memref<8x1xf32, #tpu.memory_space<vmem>>, vector<8x1xf32>
    %5 = vector.broadcast %4 : vector<8x1xf32> to vector<8x512xf32>
    %6 = arith.addf %3, %5 : vector<8x512xf32>
    %cst_6 = arith.constant 0.000000e+00 : f32
    %7 = vector.broadcast %cst_6 : f32 to vector<8x512xf32>
    %8 = arith.maximumf %6, %7 : vector<8x512xf32>
    %c0_7 = arith.constant 0 : index
    %c0_8 = arith.constant 0 : index
    %9 = vector.load %arg5[%c0_7, %c0_8] : memref<32x8xf32, #tpu.memory_space<vmem>>, vector<32x8xf32>
    %cst_9 = arith.constant dense<0.000000e+00> : vector<32x512xf32>
    %10 = tpu.matmul %9, %8, %cst_9 {dimension_numbers = #tpu.dot_dimension_numbers<[1], [0], [0], [1], [0, 0, 1, 1], [], []>} : vector<32x8xf32>, vector<8x512xf32>, vector<32x512xf32> -> vector<32x512xf32>
    %c0_10 = arith.constant 0 : index
    %c0_11 = arith.constant 0 : index
    %11 = vector.load %arg6[%c0_10, %c0_11] : memref<32x1xf32, #tpu.memory_space<vmem>>, vector<32x1xf32>
    %12 = vector.broadcast %11 : vector<32x1xf32> to vector<32x512xf32>
    %13 = arith.addf %10, %12 : vector<32x512xf32>
    %14 = arith.mulf %13, %13 : vector<32x512xf32>
    %cst_12 = arith.constant dense<0.000000e+00> : vector<512xf32>
    %15 = vector.multi_reduction <add>, %14, %cst_12 [0] : vector<32x512xf32> to vector<512xf32>
    %16 = vector.shape_cast %15 : vector<512xf32> to vector<1x512xf32>
    %cst_13 = arith.constant 1.000000e-24 : f32
    %17 = vector.broadcast %cst_13 : f32 to vector<1x512xf32>
    %18 = arith.maximumf %16, %17 : vector<1x512xf32>
    %19 = math.rsqrt %18 : vector<1x512xf32>
    %20 = vector.broadcast %19 : vector<1x512xf32> to vector<32x512xf32>
    %21 = arith.mulf %13, %20 : vector<32x512xf32>
    %c0_14 = arith.constant 0 : index
    %c0_15 = arith.constant 0 : index
    %c0_16 = arith.constant 0 : index
    %22 = vector.load %arg7[%c0_14, %c0_15, %c0_16] : memref<1x32x512xf32, #tpu.memory_space<vmem>>, vector<1x32x512xf32>
    %23 = vector.shape_cast %22 : vector<1x32x512xf32> to vector<32x512xf32>
    %24 = vector.shape_cast %21 : vector<32x512xf32> to vector<1x32x512xf32>
    tpu.vector_store %arg7[%c0_14, %c0_15, %c0_16], %24 {strides = array<i32>} : memref<1x32x512xf32, #tpu.memory_space<vmem>>, vector<1x32x512xf32>,
    return
  }
  func.func @transform_0(%arg0: i32, %arg1: i32) -> (i32, i32, i32) {
    %c0_i32 = arith.constant 0 : i32
    %c0_i32_0 = arith.constant 0 : i32
    return %arg0, %c0_i32, %arg1 : i32, i32, i32
  }
  func.func @transform_1(%arg0: i32, %arg1: i32) -> (i32, i32) {
    %c0_i32 = arith.constant 0 : i32
    %c0_i32_0 = arith.constant 0 : i32
    %c0_i32_1 = arith.constant 0 : i32
    return %c0_i32, %c0_i32_0 : i32, i32
  }
  func.func @transform_2(%arg0: i32, %arg1: i32) -> (i32, i32) {
    %c0_i32 = arith.constant 0 : i32
    %c0_i32_0 = arith.constant 0 : i32
    %c0_i32_1 = arith.constant 0 : i32
    return %c0_i32, %c0_i32_0 : i32, i32
  }
  func.func @transform_3(%arg0: i32, %arg1: i32) -> (i32, i32) {
    %c0_i32 = arith.constant 0 : i32
    %c0_i32_0 = arith.constant 0 : i32
    %c0_i32_1 = arith.constant 0 : i32
    return %c0_i32, %c0_i32_0 : i32, i32
  }
  func.func @transform_4(%arg0: i32, %arg1: i32) -> (i32, i32) {
    %c0_i32 = arith.constant 0 : i32
    %c0_i32_0 = arith.constant 0 : i32
    %c0_i32_1 = arith.constant 0 : i32
    return %c0_i32, %c0_i32_0 : i32, i32
  }
  func.func @transform_5(%arg0: i32, %arg1: i32) -> (i32, i32, i32) {
    %c0_i32 = arith.constant 0 : i32
    %c0_i32_0 = arith.constant 0 : i32
    return %arg0, %c0_i32, %arg1 : i32, i32, i32
  }
}

</mosaic_0001>

<bundles_post_ra>
// kernel: tpu_custom_call.1
= control target key start
LH: loop header
LB: loop body
LE: loop exit
PB: predicated region body
PF: predicated region fallthrough
CT: control target
= control target key end

     0   :  { %10 = vsyncpa [#allocation3], 0  ;;  %s1284_s0 = inlined_call_operand.vmem [shape: f32[2,8,512], index: 0, kind: input, shape index: {}]   ;;  %s1285_s1 = inlined_call_operand.vmem [shape: f32[8,8], index: 1, kind: input, shape index: {}]   ;;  %s1286_s2 = inlined_call_operand.vmem [shape: f32[8,1], index: 2, kind: input, shape index: {}]   ;;  %s1287_s3 = inlined_call_operand.vmem [shape: f32[32,8], index: 3, kind: input, shape index: {}]   ;;  %s1288_s4 = inlined_call_operand.vmem [shape: f32[32,1], index: 4, kind: input, shape index: {}]   ;;  %s1289_s5 = inlined_call_operand.hbm [shape: f32[2,32,512], index: 5, kind: output, shape index: {}]  }
   0x1   :  { %12 = vsyncpa [#allocation3 + $0x1], 0  ;;  %s1027_s18 = smov 0   ;;  %s1029_s19 = smov 0  }
   0x2   :  { %s1031_s20 = smov 0   ;;  %s1033_s21 = smov 0  }
   0x3   :  { %s1035_s22 = smov 0   ;;  %s1037_s23 = smov 0  }
   0x4 LB: > { %s820_s24 = sadd.s32 4294967295, %s990_s23   ;;  %s821_s25 = sadd.s32 4294967294, %s990_s23   ;;  %s990_s23 = sphi %s1037_s23, %s18_s23   ;;  %s986_s22 = sphi %s1035_s22, %s1296_s22   ;;  %s982_s21 = sphi %s1033_s21, %s1295_s21   ;;  %s978_s20 = sphi %s1031_s20, %s1294_s20   ;;  %s974_s19 = sphi %s1029_s19, %s1293_s19   ;;  %s970_s18 = sphi %s1027_s18, %s1292_s18  }
   0x5   : > { %s30_s26 = sadd.s32 1, %s986_s22  ;;  %s151_s27 = sadd.s32 1, %s978_s20 }
   0x6   : > { %p32_p0 = scmp.ge.s32.totalorder %s30_s26, 2  ;;  %p161_p1 = scmp.ne.s32.totalorder %s978_s20, %s974_s19 }
   0x7   : > { %p162_p2 = scmp.eq.s32.totalorder %s820_s24, 1  ;;  %p167_p3 = scmp.ne.s32.totalorder %s974_s19, %s970_s18 }
   0x8   : > { %s1298_s26 = smov (%p32_p0, %s30_s26), 0  ;;  %p168_p5 = scmp.eq.s32.totalorder %s821_s25, 1 }
   0x9   : > { %p1067_p4 = por %p162_p2, %p161_p1  ;;  %s146_s29 = ssub.s32 %s986_s22, %s1298_s26 }
   0xa   : > { %p824_p6 = scmp.ge.s32.totalorder %s990_s23, 1  ;;  %p149_p7 = scmp.eq.s32.totalorder %s146_s29, 0 }
   0xb   : > { %p1074_p8 = por %p168_p5, %p167_p3  ;;  %p211_p9 = scmp.lt.s32.totalorder %s990_s23, 3 }
   0xc   : > { %s1080_s6 = scalar_select %p149_p7, %s978_s20, %s151_s27  }
   0xd   : > { %p212_p10 = pnand %p824_p6, %p211_p9 }
   0xe   : > { %p244_p11 = scmp.lt.s32.totalorder (!%p212_p10), %s982_s21, 1  ;;  %s240_s17 = sand.u32 (!%p212_p10), 1, %s974_s19  }
   0xf   : > { %215 = sbr.rel (%p212_p10) target bundleno = 490 (0x1ea), region = 40  ;;  %s825_s24 = sshll.u32 (!%p212_p10), %s240_s17, 7 }
  0x10   : > { %s844_s25 = sshll.u32 (!%p212_p10), %s982_s21, 11  ;;  %s1199_s27 = scalar_lea.vmem (!%p212_p10), [#allocation2], %s825_s24 }
  0x11   : > { %s741_s29 = sshll.u32 (!%p212_p10), %s1199_s27, 4  ;;  %s1221_s8 = scalar_lea.hbm (!%p212_p10), %s1289_s5, %s844_s25  ;;  %s1223_s29 = int_to_ptr.vmem [resolvable:$true] %s741_s29 }
  0x12   : > { %s994_s11 = smov (!%p212_p10), [#allocation2]  }
  0x13   : > { %s918_s12 = sshll.u32 (!%p212_p10), %s994_s11, 4  ;;  %s919_s12 = int_to_ptr.vmem [resolvable:$false] %s918_s12 }
  0x14   : > { %v259_v0 = vld [vmem:[%s1286_s2] sm:$0xff]  ;;  %v992_v1 = vmov 0.0   ;;  %s245_s9 = scalar_select %p244_p11, %s982_s21, 1  ;;  %v993_v2 = vmov 0   ;;  %vm265_vm0 = vcmask 64512   ;;  %v422_v9 = vld [vmem:[%s1288_s4 + $0x18] sm:$0xff] }
  0x15   : > { %333 = vmatprep.mubr.f32.mxu0 %v992_v1  ;;  %404 = vmatprep.mubr.f32.mxu1 %v992_v1  ;;  %v258_v3 = vld [vmem:[%s1285_s1] sm:$0xff]  ;;  %v420_v10 = vld [vmem:[%s1288_s4 + $0x8] sm:$0xff]  ;;  %v421_v11 = vld [vmem:[%s1288_s4 + $0x10] sm:$0xff]  ;;  %p921_p1 = scmp.lt.s32.totalorder %s1223_s29, %s919_s12 }
  0x16   : > { %904 = vset.pattern.permute.xlu0 %v993_v2  ;;  %905 = vset.pattern.permute.xlu1 %v993_v2  ;;  %s843_s10 = sshll.u32 %s245_s9, 5  ;;  %v419_v8 = vld [vmem:[%s1288_s4] sm:$0xff]  ;;  %v416_v26 = vld [vmem:[%s1287_s3 + $0x8] sm:$0xff]  ;;  %v417_v27 = vld [vmem:[%s1287_s3 + $0x10] sm:$0xff]  ;;  %s1239_s9 = scalar_lea.sflag [#allocation3], %s240_s17 }
  0x17   : > { %262 = vperm.xlu0 %904, %v259_v0   ;;  %s251_s13 = scalar_lea.vmem %s1284_s0, %s843_s10  ;;  %430 = vperm.xlu1 %905, %v420_v10   ;;  %v415_v25 = vld [vmem:[%s1287_s3] sm:$0xff]  ;;  %v418_v28 = vld [vmem:[%s1287_s3 + $0x18] sm:$0xff]  ;;  %s914_s10 = scalar_lea.vmem %s1223_s29, 2048 }
  0x18   : > { %v255_v4 = vld [vmem:[%s251_s13 + $0x8] sm:$0xff]  ;;  %v257_v5 = vld [vmem:[%s251_s13 + $0x18] sm:$0xff]  ;;  %v254_v6 = vld [vmem:[%s251_s13] sm:$0xff]  ;;  %p915_p12 = scmp.ne.s32.totalorder %s1223_s29, %s914_s10 }
  0x19   : > { %299 = vmatprep.subr.mxu0 %v255_v4  ;;  %370 = vmatprep.subr.mxu1 %v257_v5  ;;  %v256_v7 = vld [vmem:[%s251_s13 + $0x10] sm:$0xff]  ;;  %s920_s13 = scalar_lea.vmem %s919_s12, 4096 }
  0x1a   : > { %300 = vmatpush1.msra.mxu0 %v254_v6  ;;  %371 = vmatpush1.msra.mxu1 %v256_v7  ;;  %p916_p13 = pnand %p915_p12, %p1067_p4  ;;  %p922_p2 = scmp.lt.s32.totalorder %s920_s13, %s914_s10 }
  0x1b   : > { %828 = vmatmul.mubr.msk.f32.vlgmr.msra.gmra.mxu0 %vm265_vm0, %v258_v3  ;;  %829 = vmatmul.mubr.msk.f32.vlgmr.msra.gmra.mxu1 %vm265_vm0, %v258_v3 }
  0x1c   : > { %425 = vperm.xlu0 %904, %v419_v8   ;;  %519 = vmatprep.mubr.f32.mxu0 %v992_v1  ;;  %p917_p0 = pneg %p916_p13  ;;  %p923_p3 = por %p922_p2, %p921_p1 }
  0x1d   : > { %608 = vmatprep.mubr.f32.mxu1 %v992_v1  ;;  %435 = vperm.xlu1 %905, %v421_v11  }
  0x1e   : > { %p924_p5 = pnand %p923_p3, %p917_p0 }
  0x20   : > { %440 = vperm.xlu0 %904, %v422_v9  }
  0x92   : > { %v263_v14 = vpop.permute.xlu0 %262  ;;  %v431_v31 = vpop.permute.xlu1 %430 }
  0x97   : > { %v426_v36 = vpop.permute.xlu0 %425 }
  0x98   : > { %v436_v43 = vpop.permute.xlu1 %435 }
  0x9b   : > { %v441_v56 = vpop.permute.xlu0 %440 }
  0xdb   : > { %v335_v12 = vpop.f32.mrf.mxu0  ;;  %v406_v13 = vpop.f32.mrf.mxu1 }
  0xdc   : > { %v336_v15 = vadd.f32 %v335_v12, %v263_v14  ;;  %v407_v16 = vadd.f32 %v406_v13, %v263_v14 }
  0xdd   : > { %v337_v17 = vpop.f32.mrf.mxu0  ;;  %v408_v18 = vpop.f32.mrf.mxu1 }
  0xde   : > { %v338_v19 = vadd.f32 %v337_v17, %v263_v14  ;;  %v409_v20 = vadd.f32 %v408_v18, %v263_v14  ;;  %v411_v23 = vmax.f32 %v336_v15, 0.0  ;;  %v413_v24 = vmax.f32 %v407_v16, 0.0 }
  0xe0   : > { %v412_v21 = vmax.f32 %v338_v19, 0.0  ;;  %v414_v22 = vmax.f32 %v409_v20, 0.0 }
  0xe2   : > { %485 = vmatprep.subr.mxu0 %v412_v21  ;;  %574 = vmatprep.subr.mxu1 %v414_v22 }
  0xe3   : > { %486 = vmatpush1.msra.mxu0 %v411_v23  ;;  %575 = vmatpush1.msra.mxu1 %v413_v24 }
  0xe4   : > { %830 = vmatmul.mubr.msk.f32.vlgmr.msra.gmra.mxu0 %vm265_vm0, %v415_v25  ;;  %834 = vmatmul.mubr.msk.f32.vlgmr.msra.gmra.mxu1 %vm265_vm0, %v415_v25 }
  0xe5   : > { %525 = vmatprep.mubr.f32.mxu0 %v992_v1  ;;  %614 = vmatprep.mubr.f32.mxu1 %v992_v1 }
  0xe8   : > { %831 = vmatmul.mubr.msk.f32.gmra.mxu0 %vm265_vm0, %v416_v26  ;;  %835 = vmatmul.mubr.msk.f32.gmra.mxu1 %vm265_vm0, %v416_v26 }
  0xe9   : > { %531 = vmatprep.mubr.f32.mxu0 %v992_v1  ;;  %620 = vmatprep.mubr.f32.mxu1 %v992_v1 }
  0xec   : > { %832 = vmatmul.mubr.msk.f32.gmra.mxu0 %vm265_vm0, %v417_v27  ;;  %836 = vmatmul.mubr.msk.f32.gmra.mxu1 %vm265_vm0, %v417_v27 }
  0xed   : > { %537 = vmatprep.mubr.f32.mxu0 %v992_v1  ;;  %626 = vmatprep.mubr.f32.mxu1 %v992_v1 }
  0xf0   : > { %833 = vmatmul.mubr.msk.f32.gmra.mxu0 %vm265_vm0, %v418_v28  ;;  %837 = vmatmul.mubr.msk.f32.gmra.mxu1 %vm265_vm0, %v418_v28 }
 0x1a4   : > { %v521_v29 = vpop.f32.mrf.mxu0  ;;  %v610_v30 = vpop.f32.mrf.mxu1 }
 0x1a5   : > { %v1131_v41 = vadd.f32 %v521_v29, %v426_v36  ;;  %v1133_v42 = vadd.f32 %v610_v30, %v426_v36 }
 0x1a6   : > { %v523_v32 = vpop.f32.mrf.mxu0  ;;  %v612_v33 = vpop.f32.mrf.mxu1 }
 0x1a7   : > { %v1143_v50 = vadd.f32 %v523_v32, %v426_v36  ;;  %v1145_v51 = vadd.f32 %v612_v33, %v426_v36  ;;  %v633_v57 = vmul.f32 %v1131_v41, %v1131_v41  ;;  %v635_v58 = vmul.f32 %v1133_v42, %v1133_v42 }
 0x1a8   : > { %v527_v34 = vpop.f32.mrf.mxu0  ;;  %v616_v35 = vpop.f32.mrf.mxu1 }
 0x1a9   : > { %v1127_v37 = vadd.f32 %v527_v34, %v431_v31  ;;  %v1129_v38 = vadd.f32 %v616_v35, %v431_v31  ;;  %v634_v7 = vmul.f32 %v1143_v50, %v1143_v50  ;;  %v636_v8 = vmul.f32 %v1145_v51, %v1145_v51 }
 0x1aa   : > { %v529_v39 = vpop.f32.mrf.mxu0  ;;  %v618_v40 = vpop.f32.mrf.mxu1 }
 0x1ab   : > { %v1135_v44 = vadd.f32 %v529_v39, %v431_v31  ;;  %v1137_v45 = vadd.f32 %v618_v40, %v431_v31  ;;  %v637_v48 = vmul.f32 %v1127_v37, %v1127_v37  ;;  %v639_v49 = vmul.f32 %v1129_v38, %v1129_v38 }
 0x1ac   : > { %v533_v46 = vpop.f32.mrf.mxu0  ;;  %v622_v47 = vpop.f32.mrf.mxu1 }
 0x1ad   : > { %v1147_v52 = vadd.f32 %v533_v46, %v436_v43  ;;  %v1149_v53 = vadd.f32 %v622_v47, %v436_v43  ;;  %v638_v61 = vmul.f32 %v1135_v44, %v1135_v44  ;;  %v640_v62 = vmul.f32 %v1137_v45, %v1137_v45 }
 0x1ae   : > { %v535_v54 = vpop.f32.mrf.mxu0  ;;  %v624_v55 = vpop.f32.mrf.mxu1  ;;  %v649_v3 = vadd.f32 %v637_v48, %v633_v57  ;;  %v667_v4 = vadd.f32 %v639_v49, %v635_v58 }
 0x1af   : > { %v1155_v59 = vadd.f32 %v535_v54, %v436_v43  ;;  %v1157_v60 = vadd.f32 %v624_v55, %v436_v43  ;;  %v641_v63 = vmul.f32 %v1147_v52, %v1147_v52  ;;  %v643_v0 = vmul.f32 %v1149_v53, %v1149_v53 }
 0x1b0   : > { %v539_v1 = vpop.f32.mrf.mxu0  ;;  %v628_v2 = vpop.f32.mrf.mxu1  ;;  %v658_v17 = vadd.f32 %v638_v61, %v634_v7  ;;  %v676_v18 = vadd.f32 %v640_v62, %v636_v8 }
 0x1b1   : > { %v1167_v5 = vadd.f32 %v539_v1, %v441_v56  ;;  %v1169_v6 = vadd.f32 %v628_v2, %v441_v56  ;;  %v642_v9 = vmul.f32 %v1155_v59, %v1155_v59  ;;  %v644_v10 = vmul.f32 %v1157_v60, %v1157_v60 }
 0x1b2   : > { %v541_v11 = vpop.f32.mrf.mxu0  ;;  %v630_v12 = vpop.f32.mrf.mxu1  ;;  %v650_v13 = vadd.f32 %v649_v3, %v641_v63  ;;  %v668_v14 = vadd.f32 %v667_v4, %v643_v0 }
 0x1b3   : > { %v645_v15 = vmul.f32 %v1167_v5, %v1167_v5  ;;  %v647_v16 = vmul.f32 %v1169_v6, %v1169_v6  ;;  %v1183_v19 = vadd.f32 %v541_v11, %v441_v56  ;;  %v1185_v20 = vadd.f32 %v630_v12, %v441_v56 }
 0x1b4   : > { %v659_v23 = vadd.f32 %v658_v17, %v642_v9  ;;  %v677_v24 = vadd.f32 %v676_v18, %v644_v10 }
 0x1b5   : > { %v651_v21 = vadd.f32 %v650_v13, %v645_v15  ;;  %v669_v22 = vadd.f32 %v668_v14, %v647_v16  ;;  %v646_v25 = vmul.f32 %v1183_v19, %v1183_v19  ;;  %v648_v26 = vmul.f32 %v1185_v20, %v1185_v20 }
 0x1b7   : > { %v652_v27 = vrot.slane %v651_v21, 4  ;;  %v670_v28 = vrot.slane %v669_v22, 4  ;;  %v660_v29 = vadd.f32 %v659_v23, %v646_v25  ;;  %v678_v30 = vadd.f32 %v677_v24, %v648_v26 }
 0x1b9   : > { %v653_v31 = vadd.f32 %v652_v27, %v651_v21  ;;  %v671_v32 = vadd.f32 %v670_v28, %v669_v22  ;;  %v661_v33 = vrot.slane %v660_v29, 4  ;;  %v679_v34 = vrot.slane %v678_v30, 4 }
 0x1bb   : > { %v654_v35 = vrot.slane %v653_v31, 2  ;;  %v672_v36 = vrot.slane %v671_v32, 2  ;;  %v662_v39 = vadd.f32 %v661_v33, %v660_v29  ;;  %v680_v40 = vadd.f32 %v679_v34, %v678_v30 }
 0x1bd   : > { %v655_v43 = vadd.f32 %v654_v35, %v653_v31  ;;  %v673_v46 = vadd.f32 %v672_v36, %v671_v32  ;;  %v663_v47 = vrot.slane %v662_v39, 2  ;;  %v681_v48 = vrot.slane %v680_v40, 2 }
 0x1bf   : > { %v656_v49 = vrot.slane %v655_v43, 1  ;;  %v674_v54 = vrot.slane %v673_v46, 1  ;;  %v664_v55 = vadd.f32 %v663_v47, %v662_v39  ;;  %v682_v56 = vadd.f32 %v681_v48, %v680_v40 }
 0x1c1   : > { %v657_v57 = vadd.f32 %v656_v49, %v655_v43  ;;  %v675_v58 = vadd.f32 %v674_v54, %v673_v46  ;;  %v665_v61 = vrot.slane %v664_v55, 1  ;;  %v683_v62 = vrot.slane %v682_v56, 1 }
 0x1c3   : > { %v685_v63 = vmax.f32 %v657_v57, 1e-24  ;;  %v687_v0 = vmax.f32 %v675_v58, 1e-24  ;;  %v666_v1 = vadd.f32 %v665_v61, %v664_v55  ;;  %v684_v2 = vadd.f32 %v683_v62, %v682_v56 }
 0x1c5   : > { %906 = vrsqrt.f32 %v685_v63  ;;  %v686_v3 = vmax.f32 %v666_v1, 1e-24  ;;  %v688_v4 = vmax.f32 %v684_v2, 1e-24 }
 0x1c6   : > { %908 = vrsqrt.f32 %v687_v0 }
 0x1c7   : > { %910 = vrsqrt.f32 %v686_v3 }
 0x1c8   : > { %912 = vrsqrt.f32 %v688_v4 }
 0x1d2   : > { %v907_v7 = vpop.eup %906 }
 0x1d3   : > { %v909_v8 = vpop.eup %908  ;;  %v693_v9 = vmul.f32 %v907_v7, %v1131_v41  ;;  %v697_v10 = vmul.f32 %v907_v7, %v1127_v37  ;;  %v701_v11 = vmul.f32 %v907_v7, %v1147_v52  ;;  %v705_v12 = vmul.f32 %v907_v7, %v1167_v5 }
 0x1d4   : > { %v695_v41 = vmul.f32 %v909_v8, %v1133_v42  ;;  %v699_v37 = vmul.f32 %v909_v8, %v1129_v38  ;;  %v703_v52 = vmul.f32 %v909_v8, %v1149_v53  ;;  %v707_v5 = vmul.f32 %v909_v8, %v1169_v6  ;;  %v911_v13 = vpop.eup %910 }
 0x1d5   : > { %709 = vst [vmem:[%s1199_s27] sm:$0xff] %v693_v9  ;;  %713 = vst [vmem:[%s1199_s27 + $0x20] sm:$0xff] %v697_v10  ;;  %v913_v14 = vpop.eup %912  ;;  %v694_v38 = vmul.f32 %v911_v13, %v1143_v50  ;;  %v698_v42 = vmul.f32 %v911_v13, %v1135_v44  ;;  %v702_v53 = vmul.f32 %v911_v13, %v1155_v59 }
 0x1d6   : > { %717 = vst [vmem:[%s1199_s27 + $0x40] sm:$0xff] %v701_v11  ;;  %721 = vst [vmem:[%s1199_s27 + $0x60] sm:$0xff] %v705_v12  ;;  %v706_v6 = vmul.f32 %v911_v13, %v1183_v19  ;;  %v696_v50 = vmul.f32 %v913_v14, %v1145_v51  ;;  %v700_v44 = vmul.f32 %v913_v14, %v1137_v45 }
 0x1d7   : > { %711 = vst [vmem:[%s1199_s27 + $0x10] sm:$0xff] %v695_v41  ;;  %715 = vst [vmem:[%s1199_s27 + $0x30] sm:$0xff] %v699_v37  ;;  %v704_v15 = vmul.f32 %v913_v14, %v1157_v60  ;;  %v708_v59 = vmul.f32 %v913_v14, %v1185_v20 }
 0x1d8   : > { %719 = vst [vmem:[%s1199_s27 + $0x50] sm:$0xff] %v703_v52  ;;  %723 = vst [vmem:[%s1199_s27 + $0x70] sm:$0xff] %v707_v5 }
 0x1d9   : > { %710 = vst [vmem:[%s1199_s27 + $0x8] sm:$0xff] %v694_v38  ;;  %714 = vst [vmem:[%s1199_s27 + $0x28] sm:$0xff] %v698_v42 }
 0x1da   : > { %718 = vst [vmem:[%s1199_s27 + $0x48] sm:$0xff] %v702_v53  ;;  %722 = vst [vmem:[%s1199_s27 + $0x68] sm:$0xff] %v706_v6 }
 0x1db   : > { %712 = vst [vmem:[%s1199_s27 + $0x18] sm:$0xff] %v696_v50  ;;  %716 = vst [vmem:[%s1199_s27 + $0x38] sm:$0xff] %v700_v44 }
 0x1dc   : > { %720 = vst [vmem:[%s1199_s27 + $0x58] sm:$0xff] %v704_v15  ;;  %724 = vst [vmem:[%s1199_s27 + $0x78] sm:$0xff] %v708_v59 }
 0x1dd   : > { %927 = shalt.err (!%p924_p5)
}
 0x1de   : > { %s928_s14 = scalar_lea.hbm %s1221_s8, 2048  ;;  %s932_s17 = scalar_lea.hbm %s1289_s5, 4096 }
 0x1df   : > { %p929_p6 = scmp.ne.s32.totalorder %s1221_s8, %s928_s14  ;;  %p933_p10 = scmp.lt.s32.totalorder %s1221_s8, %s1289_s5 }
 0x1e0   : > { %p934_p11 = scmp.lt.s32.totalorder %s932_s17, %s928_s14 }
 0x1e1   : > { %p930_p7 = pnand %p929_p6, %p1067_p4 }
 0x1e2   : > { %p935_p12 = por %p934_p11, %p933_p10 }
 0x1e3   : > { %p931_p9 = pneg %p930_p7 }
 0x1e5   : > { %p936_p13 = pnand %p935_p12, %p931_p9 }
 0x1e7   : > { %939 = shalt.err (!%p936_p13)
}
 0x1e8   : > { %s995_s27 = smov 512   ;;  %s996_s21 = smov 32  }
 0x1e9   : > { %845 = dma.vmem_to_hbm [thread:$0]  (%p1067_p4), %s1223_s29, 2048, %s1221_s8, %s1239_s9, %s995_s27, %s995_s27, %s996_s21  }
 0x1ea PF: > { %p851_p0 = scmp.ge.s32.totalorder %s990_s23, 2  ;;  %s756_s7 = sand.u32 1, %s970_s18  }
 0x1eb   : > { %s757_s10 = scalar_lea.sflag [#allocation3], %s756_s7 }
 0x1ec   : > { %p848_p1 = pnand %p851_p0, %p1074_p8 }
 0x1ee   : > { %p849_p2 = pneg %p848_p1 }
 0x1f0   : > { %965 = dma.done.wait (%p849_p2), %s757_s10, 2048  }
 0x1f1   : > { %967 = vsyncadd (%p849_p2), %s757_s10, 4294965248  ;;  %s18_s23 = sadd.s32 1, %s990_s23   ;;  %s1292_s18 = smov %s974_s19 }
 0x1f2   : > { %p15_p3 = scmp.ge.s32.totalorder %s18_s23, 4   ;;  %s1293_s19 = smov %s978_s20 }
 0x1f3   : > { %s1294_s20 = smov %s1080_s6  ;;  %s1295_s21 = smov %s986_s22 }
 0x1f4   : > { %s1296_s22 = smov %s1298_s26  ;;  %17 = sbr.rel (!%p15_p3) target bundleno = 4 (0x4), region = 75 }
 0x1f9   :  { %762 = vsyncpa [#allocation3], 1 }
 0x1fa   :  { %764 = vsyncpa [#allocation3 + $0x1], 1 }

</bundles_post_ra>
